<compile_context>
chip_gen: v5e
topology: v5e:2x2
jax: 0.10.0
libtpu: 0.0.40
codegen_flags: <defaults>
</compile_context>

<pallas_src>
import jax
import jax.numpy as jnp
from jax.experimental import pallas as pl
from jax.experimental.pallas import tpu as pltpu

K_IN = 784       # 28*28 (full last dim of x => no lane padding needed)
H1 = 128
H2 = 64
N_OUT = 10
N_PAD = 128      # lane-dense output block


def mlp_kernel(x_ref, w1_ref, b1_ref, w2_ref, b2_ref, w3_ref, b3_ref, o_ref):
    # x_ref: (TB, 784) f32 batch tile streamed from HBM; weights are resident.
    # Cast to bf16 in-kernel (VPU has slack; halves MXU operand width).
    x = x_ref[...].astype(jnp.bfloat16)

    # Linear(784 -> 128) + ReLU : bf16 operands, f32 accumulation on the MXU.
    h1 = jnp.dot(x, w1_ref[...], preferred_element_type=jnp.float32)
    h1 = jnp.maximum(h1 + b1_ref[...], 0.0)

    # Linear(128 -> 64) + ReLU (tiny, kept in f32).
    h2 = jnp.dot(h1, w2_ref[...], preferred_element_type=jnp.float32)
    h2 = jnp.maximum(h2 + b2_ref[...], 0.0)

    # Linear(64 -> 10), padded to 128 output lanes (zero weight/bias columns).
    logits = jnp.dot(h2, w3_ref[...], preferred_element_type=jnp.float32) + b3_ref[...]

    # Numerically stable log_softmax over the 10 real columns only: padded
    # lanes are masked to a huge negative so they contribute exp(.) = 0.
    col = jax.lax.broadcasted_iota(jnp.int32, logits.shape, 1)
    masked = jnp.where(col < N_OUT, logits, jnp.float32(-1e30))
    m = jnp.max(masked, axis=-1, keepdims=True)
    shifted = masked - m
    lse = jnp.log(jnp.sum(jnp.exp(shifted), axis=-1, keepdims=True))
    o_ref[...] = (shifted - lse).astype(o_ref.dtype)


def _round8(n):
    return ((n + 7) // 8) * 8


def _pick_tb(batch):
    # Large tiles amortize per-step overhead (measured ~85%+ of HBM roofline at
    # 512-1024 rows); keep >= 2 grid steps when possible so the "parallel"
    # batch axis can shard across the two v7x TensorCores.
    if batch >= 2048:
        return 1024
    half = -(-batch // 2)
    return min(1024, max(8, _round8(half)))


def our_fc_forward(x_nchw, params, *, tb=None):
    """x_nchw: (B, 1, 28, 28) float32. Returns (B, 10) log-probabilities."""
    w1, b1, w2, b2, w3, b3 = params
    B = x_nchw.shape[0]
    x = x_nchw.reshape(B, K_IN)          # same semantics as torch x.view(-1, 784)

    if tb is None:
        tb = _pick_tb(B)
    tb = max(8, _round8(tb))
    if tb > B:
        tb = B                           # full-dim block always satisfies (8,128) rule

    grid_b = pl.cdiv(B, tb)              # ragged last block handled by Pallas (no pad)

    # Tiny resident weights: bf16 first layer, lane-dense padded last layer.
    w1b = w1.astype(jnp.bfloat16)
    w3p = jnp.pad(w3, ((0, 0), (0, N_PAD - N_OUT)))
    b3p = jnp.pad(b3, ((0, 0), (0, N_PAD - N_OUT)))

    flops = 2 * B * (K_IN * H1 + H1 * H2 + H2 * N_PAD)
    bytes_accessed = (B * K_IN * 4 + B * N_PAD * 4                 # x in (f32), out (f32)
                      + K_IN * H1 * 2 + H1 * H2 * 4 + H2 * N_PAD * 4
                      + (H1 + H2 + N_PAD) * 4)                     # biases

    out = pl.pallas_call(
        mlp_kernel,
        out_shape=jax.ShapeDtypeStruct((B, N_PAD), jnp.float32),
        grid_spec=pltpu.PrefetchScalarGridSpec(
            num_scalar_prefetch=0,
            grid=(grid_b,),
            in_specs=[
                pl.BlockSpec((tb, K_IN), lambda i: (i, 0)),    # x tile (f32, streamed)
                pl.BlockSpec((K_IN, H1), lambda i: (0, 0)),    # w1 (resident, bf16)
                pl.BlockSpec((1, H1), lambda i: (0, 0)),       # b1
                pl.BlockSpec((H1, H2), lambda i: (0, 0)),      # w2
                pl.BlockSpec((1, H2), lambda i: (0, 0)),       # b2
                pl.BlockSpec((H2, N_PAD), lambda i: (0, 0)),   # w3 (padded lanes)
                pl.BlockSpec((1, N_PAD), lambda i: (0, 0)),    # b3 (padded lanes)
            ],
            out_specs=pl.BlockSpec((tb, N_PAD), lambda i: (i, 0)),
        ),
        compiler_params=pltpu.CompilerParams(
            dimension_semantics=("parallel",),
        ),
        cost_estimate=pl.CostEstimate(
            flops=flops,
            transcendentals=B * N_PAD,
            bytes_accessed=bytes_accessed,
        ),
    )(x, w1b, b1, w2, b2, w3p, b3p)

    # Keep f32 (B, 10) to match the PyTorch module exactly; a consumer that can
    # index the padded 128-lane slab directly could skip this slice.
    return out[:, :N_OUT]


def our_fc_reference(x_nchw, params):
    """Pure-JAX f32 reference of the PyTorch forward pass."""
    w1, b1, w2, b2, w3, b3 = params
    x = x_nchw.reshape(x_nchw.shape[0], K_IN)
    h1 = jnp.maximum(x @ w1 + b1, 0.0)
    h2 = jnp.maximum(h1 @ w2 + b2, 0.0)
    logits = h2 @ w3 + b3
    return jax.nn.log_softmax(logits, axis=-1)


def init_params(key):
    """Deterministic init mirroring nn.Linear default (U(-1/sqrt(fan_in), +))."""
    def linear(k, fan_in, fan_out):
        kw, kb = jax.random.split(k)
        bound = 1.0 / (fan_in ** 0.5)
        # stored transposed vs torch (fan_in, fan_out) so kernel does x @ W
        w = jax.random.uniform(kw, (fan_in, fan_out), jnp.float32, -bound, bound)
        b = jax.random.uniform(kb, (1, fan_out), jnp.float32, -bound, bound)
        return w, b

    k1, k2, k3 = jax.random.split(key, 3)
    w1, b1 = linear(k1, K_IN, H1)
    w2, b2 = linear(k2, H1, H2)
    w3, b3 = linear(k3, H2, N_OUT)
    return w1, b1, w2, b2, w3, b3


if __name__ == "__main__":
    key = jax.random.PRNGKey(0)
    kx, kp = jax.random.split(key)

    B = 16  # gives a 2-step grid with the default tile heuristic
    x = jax.random.normal(kx, (B, 1, 28, 28), dtype=jnp.float32)
    params = init_params(kp)

    out = jax.block_until_ready(our_fc_forward(x, params))
    assert out.shape == (B, N_OUT)

    # log-probs should exponentiate-sum to ~1 per row
    row_sums = jnp.exp(out).sum(-1)
    assert bool(jnp.all(jnp.abs(row_sums - 1.0) < 1e-3))

    # match the pure-JAX f32 reference (bf16 x-stream => loose tolerance)
    ref = our_fc_reference(x, params)
    assert bool(jnp.max(jnp.abs(out - ref)) < 5e-2)

    # Ragged batch (B not a multiple of the tile) exercises the no-pad path.
    B2 = 13
    x2 = jax.random.normal(kx, (B2, 1, 28, 28), dtype=jnp.float32)
    out2 = jax.block_until_ready(our_fc_forward(x2, params))
    assert out2.shape == (B2, N_OUT)
    ref2 = our_fc_reference(x2, params)
    assert bool(jnp.max(jnp.abs(out2 - ref2)) < 5e-2)

    print("KERNEL_OK")
</pallas_src>

<mosaic_0001>
module attributes {stable_mosaic.version = 11 : i64} {
  func.func @mlp_kernel(%arg0: i32, %arg1: memref<8x784xf32, #tpu.memory_space<vmem>>, %arg2: memref<784x128xbf16, #tpu.memory_space<vmem>>, %arg3: memref<1x128xf32, #tpu.memory_space<vmem>>, %arg4: memref<128x64xf32, #tpu.memory_space<vmem>>, %arg5: memref<1x64xf32, #tpu.memory_space<vmem>>, %arg6: memref<64x128xf32, #tpu.memory_space<vmem>>, %arg7: memref<1x128xf32, #tpu.memory_space<vmem>>, %arg8: memref<8x128xf32, #tpu.memory_space<vmem>>) attributes {dimension_semantics = [#tpu.dimension_semantics<parallel>], iteration_bounds = array<i64: 2>, scalar_prefetch = 0 : i64, scratch_operands = 0 : i64, tpu.core_type = #tpu.core_type<tc>, window_params = [{transform_indices = @transform_0, window_bounds = array<i64: 8, 784>}, {pipeline_mode = #tpu.pipeline_mode<synchronous>, transform_indices = @transform_1, window_bounds = array<i64: 784, 128>}, {pipeline_mode = #tpu.pipeline_mode<synchronous>, transform_indices = @transform_2, window_bounds = array<i64: 1, 128>}, {pipeline_mode = #tpu.pipeline_mode<synchronous>, transform_indices = @transform_3, window_bounds = array<i64: 128, 64>}, {pipeline_mode = #tpu.pipeline_mode<synchronous>, transform_indices = @transform_4, window_bounds = array<i64: 1, 64>}, {pipeline_mode = #tpu.pipeline_mode<synchronous>, transform_indices = @transform_5, window_bounds = array<i64: 64, 128>}, {pipeline_mode = #tpu.pipeline_mode<synchronous>, transform_indices = @transform_6, window_bounds = array<i64: 1, 128>}, {transform_indices = @transform_7, window_bounds = array<i64: 8, 128>}]} {
    %c0 = arith.constant 0 : index
    %c0_0 = arith.constant 0 : index
    %0 = vector.load %arg1[%c0, %c0_0] : memref<8x784xf32, #tpu.memory_space<vmem>>, vector<8x784xf32>
    %1 = arith.truncf %0 : vector<8x784xf32> to vector<8x784xbf16>
    %c0_1 = arith.constant 0 : index
    %c0_2 = arith.constant 0 : index
    %2 = vector.load %arg2[%c0_1, %c0_2] : memref<784x128xbf16, #tpu.memory_space<vmem>>, vector<784x128xbf16>
    %cst = arith.constant dense<0.000000e+00> : vector<8x128xf32>
    %3 = tpu.matmul %1, %2, %cst {dimension_numbers = #tpu.dot_dimension_numbers<[1], [0], [0], [1], [0, 0, 1, 1], [], []>} : vector<8x784xbf16>, vector<784x128xbf16>, vector<8x128xf32> -> vector<8x128xf32>
    %c0_3 = arith.constant 0 : index
    %c0_4 = arith.constant 0 : index
    %4 = vector.load %arg3[%c0_3, %c0_4] : memref<1x128xf32, #tpu.memory_space<vmem>>, vector<1x128xf32>
    %5 = vector.broadcast %4 : vector<1x128xf32> to vector<8x128xf32>
    %6 = arith.addf %3, %5 : vector<8x128xf32>
    %cst_5 = arith.constant 0.000000e+00 : f32
    %7 = vector.broadcast %cst_5 : f32 to vector<8x128xf32>
    %8 = arith.maximumf %6, %7 : vector<8x128xf32>
    %c0_6 = arith.constant 0 : index
    %c0_7 = arith.constant 0 : index
    %9 = vector.load %arg4[%c0_6, %c0_7] : memref<128x64xf32, #tpu.memory_space<vmem>>, vector<128x64xf32>
    %cst_8 = arith.constant dense<0.000000e+00> : vector<8x64xf32>
    %10 = tpu.matmul %8, %9, %cst_8 {dimension_numbers = #tpu.dot_dimension_numbers<[1], [0], [0], [1], [0, 0, 1, 1], [], []>} : vector<8x128xf32>, vector<128x64xf32>, vector<8x64xf32> -> vector<8x64xf32>
    %c0_9 = arith.constant 0 : index
    %c0_10 = arith.constant 0 : index
    %11 = vector.load %arg5[%c0_9, %c0_10] : memref<1x64xf32, #tpu.memory_space<vmem>>, vector<1x64xf32>
    %12 = vector.broadcast %11 : vector<1x64xf32> to vector<8x64xf32>
    %13 = arith.addf %10, %12 : vector<8x64xf32>
    %cst_11 = arith.constant 0.000000e+00 : f32
    %14 = vector.broadcast %cst_11 : f32 to vector<8x64xf32>
    %15 = arith.maximumf %13, %14 : vector<8x64xf32>
    %c0_12 = arith.constant 0 : index
    %c0_13 = arith.constant 0 : index
    %16 = vector.load %arg6[%c0_12, %c0_13] : memref<64x128xf32, #tpu.memory_space<vmem>>, vector<64x128xf32>
    %cst_14 = arith.constant dense<0.000000e+00> : vector<8x128xf32>
    %17 = tpu.matmul %15, %16, %cst_14 {dimension_numbers = #tpu.dot_dimension_numbers<[1], [0], [0], [1], [0, 0, 1, 1], [], []>} : vector<8x64xf32>, vector<64x128xf32>, vector<8x128xf32> -> vector<8x128xf32>
    %c0_15 = arith.constant 0 : index
    %c0_16 = arith.constant 0 : index
    %18 = vector.load %arg7[%c0_15, %c0_16] : memref<1x128xf32, #tpu.memory_space<vmem>>, vector<1x128xf32>
    %19 = vector.broadcast %18 : vector<1x128xf32> to vector<8x128xf32>
    %20 = arith.addf %17, %19 : vector<8x128xf32>
    %21 = tpu.iota {dimensions = array<i32: 1>} : vector<8x128xi32>
    %c10_i32 = arith.constant 10 : i32
    %22 = vector.broadcast %c10_i32 : i32 to vector<8x128xi32>
    %23 = arith.cmpi slt, %21, %22 : vector<8x128xi32>
    %cst_17 = arith.constant -1.000000e+30 : f32
    %24 = vector.broadcast %cst_17 : f32 to vector<8x128xf32>
    %25 = arith.select %23, %20, %24 : vector<8x128xi1>, vector<8x128xf32>
    %cst_18 = arith.constant dense<0xFF800000> : vector<8xf32>
    %26 = vector.multi_reduction <maximumf>, %25, %cst_18 [1] : vector<8x128xf32> to vector<8xf32>
    %27 = vector.shape_cast %26 : vector<8xf32> to vector<8x1xf32>
    %28 = vector.broadcast %27 : vector<8x1xf32> to vector<8x128xf32>
    %29 = arith.subf %25, %28 : vector<8x128xf32>
    %30 = math.exp %29 : vector<8x128xf32>
    %cst_19 = arith.constant dense<0.000000e+00> : vector<8xf32>
    %31 = vector.multi_reduction <add>, %30, %cst_19 [1] : vector<8x128xf32> to vector<8xf32>
    %32 = vector.shape_cast %31 : vector<8xf32> to vector<8x1xf32>
    %33 = math.log %32 : vector<8x1xf32>
    %34 = vector.broadcast %33 : vector<8x1xf32> to vector<8x128xf32>
    %35 = arith.subf %29, %34 : vector<8x128xf32>
    %c0_20 = arith.constant 0 : index
    %c0_21 = arith.constant 0 : index
    %36 = vector.load %arg8[%c0_20, %c0_21] : memref<8x128xf32, #tpu.memory_space<vmem>>, vector<8x128xf32>
    tpu.vector_store %arg8[%c0_20, %c0_21], %35 {strides = array<i32>} : memref<8x128xf32, #tpu.memory_space<vmem>>, vector<8x128xf32>,
    return
  }
  func.func @transform_0(%arg0: i32) -> (i32, i32) {
    %c0_i32 = arith.constant 0 : i32
    %c0_i32_0 = arith.constant 0 : i32
    return %arg0, %c0_i32 : i32, i32
  }
  func.func @transform_1(%arg0: i32) -> (i32, i32) {
    %c0_i32 = arith.constant 0 : i32
    %c0_i32_0 = arith.constant 0 : i32
    %c0_i32_1 = arith.constant 0 : i32
    return %c0_i32, %c0_i32_0 : i32, i32
  }
  func.func @transform_2(%arg0: i32) -> (i32, i32) {
    %c0_i32 = arith.constant 0 : i32
    %c0_i32_0 = arith.constant 0 : i32
    %c0_i32_1 = arith.constant 0 : i32
    return %c0_i32, %c0_i32_0 : i32, i32
  }
  func.func @transform_3(%arg0: i32) -> (i32, i32) {
    %c0_i32 = arith.constant 0 : i32
    %c0_i32_0 = arith.constant 0 : i32
    %c0_i32_1 = arith.constant 0 : i32
    return %c0_i32, %c0_i32_0 : i32, i32
  }
  func.func @transform_4(%arg0: i32) -> (i32, i32) {
    %c0_i32 = arith.constant 0 : i32
    %c0_i32_0 = arith.constant 0 : i32
    %c0_i32_1 = arith.constant 0 : i32
    return %c0_i32, %c0_i32_0 : i32, i32
  }
  func.func @transform_5(%arg0: i32) -> (i32, i32) {
    %c0_i32 = arith.constant 0 : i32
    %c0_i32_0 = arith.constant 0 : i32
    %c0_i32_1 = arith.constant 0 : i32
    return %c0_i32, %c0_i32_0 : i32, i32
  }
  func.func @transform_6(%arg0: i32) -> (i32, i32) {
    %c0_i32 = arith.constant 0 : i32
    %c0_i32_0 = arith.constant 0 : i32
    %c0_i32_1 = arith.constant 0 : i32
    return %c0_i32, %c0_i32_0 : i32, i32
  }
  func.func @transform_7(%arg0: i32) -> (i32, i32) {
    %c0_i32 = arith.constant 0 : i32
    %c0_i32_0 = arith.constant 0 : i32
    return %arg0, %c0_i32 : i32, i32
  }
}

</mosaic_0001>

<bundles_post_ra>
// kernel: tpu_custom_call.1
= control target key start
LH: loop header
LB: loop body
LE: loop exit
PB: predicated region body
PF: predicated region fallthrough
CT: control target
= control target key end

     0   :  { %12 = vsyncpa [#allocation3], 0  ;;  %s1625_s0 = inlined_call_operand.vmem [shape: f32[16,784], index: 0, kind: input, shape index: {}]   ;;  %s1626_s1 = inlined_call_operand.hbm [shape: bf16[784,128], index: 1, kind: input, shape index: {}]   ;;  %s1627_s2 = inlined_call_operand.vmem [shape: f32[1,128], index: 2, kind: input, shape index: {}]   ;;  %s1628_s3 = inlined_call_operand.vmem [shape: f32[128,64], index: 3, kind: input, shape index: {}]   ;;  %s1629_s4 = inlined_call_operand.vmem [shape: f32[1,64], index: 4, kind: input, shape index: {}]   ;;  %s1630_s5 = inlined_call_operand.vmem [shape: f32[64,128], index: 5, kind: input, shape index: {}]   ;;  %s1631_s6 = inlined_call_operand.vmem [shape: f32[1,128], index: 6, kind: input, shape index: {}]   ;;  %s1632_s7 = inlined_call_operand.hbm [shape: f32[16,128], index: 7, kind: output, shape index: {}]  }
   0x1   :  { %13 = vsyncpa [#allocation4], 0 }
   0x2   :  { %15 = vsyncpa [#allocation4 + $0x1], 0  ;;  %s1440_s24 = smov 0   ;;  %s1442_s25 = smov 0  }
   0x3   :  { %s1444_s26 = smov 0   ;;  %s1446_s27 = smov 0  }
   0x4 LB: > { %s1461_s28 = sadd.s32 4294967295, %s1395_s27   ;;  %s980_s29 = sadd.s32 4294967294, %s1395_s27   ;;  %s1395_s27 = sphi %s1446_s27, %s1638_s27   ;;  %s1391_s26 = sphi %s1444_s26, %s1637_s26   ;;  %s1387_s25 = sphi %s1442_s25, %s1636_s25   ;;  %s1383_s24 = sphi %s1440_s24, %s1635_s24  }
   0x5   : > { %s1465_s30 = sadd.s32 1, %s1395_s27   ;;  %s180_s8 = sadd.s32 1, %s1391_s26 }
   0x6   : > { %s177_s9 = ssub.s32 %s1395_s27, %s1465_s30  ;;  %p190_p0 = scmp.ne.s32.totalorder %s1391_s26, %s1387_s25 }
   0x7   : > { %p178_p1 = scmp.eq.s32.totalorder %s177_s9, 0  ;;  %p191_p2 = scmp.eq.s32.totalorder %s1461_s28, 1 }
   0x8   : > { %p196_p3 = scmp.ne.s32.totalorder %s1387_s25, %s1383_s24  ;;  %p197_p4 = scmp.eq.s32.totalorder %s980_s29, 1 }
   0x9   : > { %s1476_s10 = scalar_select %p178_p1, %s1391_s26, %s180_s8  }
   0xa   : > { %p1478_p5 = por %p191_p2, %p190_p0  ;;  %p1482_p6 = por %p197_p4, %p196_p3 }
   0xb   : > { %p981_p7 = scmp.ge.s32.totalorder %s1395_s27, 1  ;;  %p204_p8 = scmp.lt.s32.totalorder %s1395_s27, 3 }
   0xc   : > { %p1254_p9 = scmp.eq.s32.totalorder %s1461_s28, 0  ;;  %s215_s15 = sshll.u32 %s1626_s1, 4  ;;  %s216_s15 = int_to_ptr.hbm [resolvable:$true] %s215_s15 }
   0xd   : > { %p205_p10 = pnand %p981_p7, %p204_p8  ;;  %s1397_s16 = smov [#allocation2]  }
   0xe   : > { %s217_s17 = sshll.u32 %s1397_s16, 4  ;;  %s1398_s18 = smov 64   ;;  %s218_s17 = int_to_ptr.vmem [resolvable:$true] %s217_s17 }
   0xf   : > { %p1246_p11 = pneg %p205_p10  ;;  %s1399_s19 = smov 4  }
  0x10   : > { %256 = sbr.rel (%p205_p10) target bundleno = 748 (0x2ec), region = 48 }
  0x11   : > { %p1247_p12 = pnand %p1254_p9, %p1246_p11 }
  0x13   : > { %1249 = dma.hbm_to_vmem [thread:$0]  (!%p1247_p12), %s216_s15, 6272, %s218_s17, [#allocation3], %s1398_s18, %s1398_s18, %s1399_s19  }
  0x15   : > { %1374 = dma.done.wait (%p1254_p9), [#allocation3], 6272  }
  0x16   : > { %1376 = vsyncadd (%p1254_p9), [#allocation3], 4294961024  ;;  %v1197_v0 = vld [vmem:[#allocation2 + $0x38] sm:$0xff]  ;;  %v1196_v3 = vld [vmem:[#allocation2 + $0x30] sm:$0xff]  ;;  %p289_p13 = scmp.lt.s32.totalorder %s1461_s28, 1  ;;  %vm705_vm0 = vcmask 130048  }
  0x17   : > { %v1205_v1 = vld [vmem:[#allocation2 + $0x78] sm:$0xff]  ;;  %709 = vmatpush.bf16.msra.mxu0 %v1197_v0  ;;  %v1204_v4 = vld [vmem:[#allocation2 + $0x70] sm:$0xff]  ;;  %v1195_v8 = vld [vmem:[#allocation2 + $0x28] sm:$0xff]  ;;  %vm854_vm1 = vcmask 523264   ;;  %s286_s23 = sand.u32 1, %s1387_s25   ;;  %s1187_s8 = sshll.u32 %s1461_s28, 3 }
  0x18   : > { %v1213_v2 = vld [vmem:[#allocation2 + $0xb8] sm:$0xff]  ;;  %722 = vmatpush.bf16.msra.mxu1 %v1205_v1  ;;  %v1212_v5 = vld [vmem:[#allocation2 + $0xb0] sm:$0xff]  ;;  %v1203_v9 = vld [vmem:[#allocation2 + $0x68] sm:$0xff]  ;;  %s290_s20 = scalar_select %p289_p13, %s1461_s28, 1 }
  0x19   : > { %735 = vmatpush.bf16.msra.mxu2 %v1213_v2  ;;  %v1221_v6 = vld [vmem:[#allocation2 + $0xf8] sm:$0xff]  ;;  %v1220_v7 = vld [vmem:[#allocation2 + $0xf0] sm:$0xff]  ;;  %v1211_v10 = vld [vmem:[#allocation2 + $0xa8] sm:$0xff]  ;;  %s904_s14 = scalar_lea.hbm %s1632_s7, %s1187_s8  ;;  %s894_s18 = scalar_lea.sflag [#allocation4], %s286_s23 }
  0x1a   : > { %748 = vmatpush.bf16.msra.mxu3 %v1221_v6  ;;  %v1219_v11 = vld [vmem:[#allocation2 + $0xe8] sm:$0xff]  ;;  %v1194_v12 = vld [vmem:[#allocation2 + $0x20] sm:$0xff]  ;;  %v1193_v16 = vld [vmem:[#allocation2 + $0x18] sm:$0xff]  ;;  %s1239_s21 = smul.u32 56, %s290_s20  ;;  %s908_s17 = sshll.u32 %s904_s14, 4  ;;  %s909_s17 = int_to_ptr.hbm [resolvable:$true] %s908_s17 }
  0x1b   : > { %710 = vmatpush.bf16.msra.mxu0 %v1196_v3  ;;  %v1202_v13 = vld [vmem:[#allocation2 + $0x60] sm:$0xff]  ;;  %v1201_v17 = vld [vmem:[#allocation2 + $0x58] sm:$0xff]  ;;  %v1192_v20 = vld [vmem:[#allocation2 + $0x10] sm:$0xff]  ;;  %s1343_s19 = sshra.s32 %s909_s17, 4  ;;  %s1349_s22 = scalar_lea.hbm %s1632_s7, 16  ;;  %s1344_s19 = int_to_ptr.hbm [resolvable:$true] %s1343_s19 }
  0x1c   : > { %723 = vmatpush.bf16.msra.mxu1 %v1204_v4  ;;  %v1210_v14 = vld [vmem:[#allocation2 + $0xa0] sm:$0xff]  ;;  %v1209_v18 = vld [vmem:[#allocation2 + $0x98] sm:$0xff]  ;;  %v1200_v21 = vld [vmem:[#allocation2 + $0x50] sm:$0xff]  ;;  %s1503_s29 = scalar_lea.vmem %s1625_s0, %s1239_s21  ;;  %s1345_s20 = scalar_lea.hbm %s1344_s19, 8 }
  0x1d   : > { %736 = vmatpush.bf16.msra.mxu2 %v1212_v5  ;;  %v1218_v15 = vld [vmem:[#allocation2 + $0xe0] sm:$0xff]  ;;  %v1217_v19 = vld [vmem:[#allocation2 + $0xd8] sm:$0xff]  ;;  %v1208_v22 = vld [vmem:[#allocation2 + $0x90] sm:$0xff]  ;;  %p1346_p0 = scmp.ne.s32.totalorder %s1344_s19, %s1345_s20  ;;  %p1350_p3 = scmp.lt.s32.totalorder %s1344_s19, %s1632_s7 }
  0x1e   : > { %749 = vmatpush.bf16.msra.mxu3 %v1220_v7  ;;  %v1216_v23 = vld [vmem:[#allocation2 + $0xd0] sm:$0xff]  ;;  %v1191_v24 = vld [vmem:[#allocation2 + $0x8] sm:$0xff]  ;;  %v1190_v27 = vld [vmem:[#allocation2] sm:$0xff]  ;;  %p1351_p4 = scmp.lt.s32.totalorder %s1349_s22, %s1345_s20 }
  0x1f   : > { %711 = vmatpush.bf16.msra.mxu0 %v1195_v8  ;;  %v1199_v25 = vld [vmem:[#allocation2 + $0x48] sm:$0xff]  ;;  %v1198_v29 = vld [vmem:[#allocation2 + $0x40] sm:$0xff]  ;;  %v1229_v32 = vld [vmem:[#allocation2 + $0x138] sm:$0xff]  ;;  %p1347_p1 = pnand %p1346_p0, %p1478_p5 }
  0x20   : > { %724 = vmatpush.bf16.msra.mxu1 %v1203_v9  ;;  %v1207_v26 = vld [vmem:[#allocation2 + $0x88] sm:$0xff]  ;;  %v295_v30 = vld [vmem:[%s1503_s29] sm:$0xff]  ;;  %v1237_v33 = vld [vmem:[#allocation2 + $0x178] sm:$0xff]  ;;  %p1352_p7 = por %p1351_p4, %p1350_p3 }
  0x21   : > { %737 = vmatpush.bf16.msra.mxu2 %v1211_v10  ;;  %v1215_v28 = vld [vmem:[#allocation2 + $0xc8] sm:$0xff]  ;;  %v1206_v34 = vld [vmem:[#allocation2 + $0x80] sm:$0xff]  ;;  %v297_v35 = vld [vmem:[%s1503_s29 + $0x10] sm:$0xff]  ;;  %v302_v36 = vpack.c.bf16 %v295_v30, %v295_v30  ;;  %p1348_p2 = pneg %p1347_p1 }
  0x22   : > { %750 = vmatpush.bf16.msra.mxu3 %v1219_v11  ;;  %v296_v31 = vld [vmem:[%s1503_s29 + $0x8] sm:$0xff]  ;;  %v1214_v38 = vld [vmem:[#allocation2 + $0xc0] sm:$0xff]  ;;  %v298_v40 = vld [vmem:[%s1503_s29 + $0x18] sm:$0xff]  ;;  %v304_v43 = vpack.c.bf16 %v297_v35, %v297_v35 }
  0x23   : > { %712 = vmatpush.bf16.msra.mxu0 %v1194_v12  ;;  %v303_v37 = vpack.c.bf16 %v296_v31, %v296_v31  ;;  %v1238_v39 = vld [vmem:[#allocation2 + $0x180] sm:$0xff]  ;;  %v1228_v41 = vld [vmem:[#allocation2 + $0x130] sm:$0xff]  ;;  %v305_v44 = vpack.c.bf16 %v298_v40, %v298_v40  ;;  %v1227_v45 = vld [vmem:[#allocation2 + $0x128] sm:$0xff]  ;;  %p1353_p8 = pnand %p1352_p7, %p1348_p2 }
  0x24   : > { %725 = vmatpush.bf16.msra.mxu1 %v1202_v13  ;;  %v1236_v42 = vld [vmem:[#allocation2 + $0x170] sm:$0xff]  ;;  %v1235_v46 = vld [vmem:[#allocation2 + $0x168] sm:$0xff]  ;;  %v1226_v47 = vld [vmem:[#allocation2 + $0x120] sm:$0xff] }
  0x25   : > { %738 = vmatpush.bf16.msra.mxu2 %v1210_v14  ;;  %v1234_v48 = vld [vmem:[#allocation2 + $0x160] sm:$0xff]  ;;  %v1225_v49 = vld [vmem:[#allocation2 + $0x118] sm:$0xff]  ;;  %v301_v51 = vld [vmem:[%s1503_s29 + $0x30] sm:$0xff] }
  0x26   : > { %751 = vmatpush.bf16.msra.mxu3 %v1218_v15  ;;  %v1233_v50 = vld [vmem:[#allocation2 + $0x158] sm:$0xff]  ;;  %v1224_v52 = vld [vmem:[#allocation2 + $0x110] sm:$0xff]  ;;  %v308_v54 = vpack.c.bf16 %v301_v51, %v301_v51  ;;  %v1223_v55 = vld [vmem:[#allocation2 + $0x108] sm:$0xff] }
  0x27   : > { %713 = vmatpush.bf16.msra.mxu0 %v1193_v16  ;;  %v1232_v53 = vld [vmem:[#allocation2 + $0x150] sm:$0xff]  ;;  %v1231_v56 = vld [vmem:[#allocation2 + $0x148] sm:$0xff]  ;;  %v1222_v57 = vld [vmem:[#allocation2 + $0x100] sm:$0xff] }
  0x28   : > { %726 = vmatpush.bf16.msra.mxu1 %v1201_v17  ;;  %v1230_v58 = vld [vmem:[#allocation2 + $0x140] sm:$0xff]  ;;  %v300_v60 = vld [vmem:[%s1503_s29 + $0x28] sm:$0xff]  ;;  %v816_v63 = vld [vmem:[%s1628_s3 + $0x78] sm:$0xff] }
  0x29   : > { %739 = vmatpush.bf16.msra.mxu2 %v1209_v18  ;;  %v299_v59 = vld [vmem:[%s1503_s29 + $0x20] sm:$0xff]  ;;  %v307_v62 = vpack.c.bf16 %v300_v60, %v300_v60  ;;  %v815_v0 = vld [vmem:[%s1628_s3 + $0x70] sm:$0xff]  ;;  %v814_v1 = vld [vmem:[%s1628_s3 + $0x68] sm:$0xff]  ;;  %s986_s29 = sshll.u32 %s286_s23, 3 }
  0x2a   : > { %752 = vmatpush.bf16.msra.mxu3 %v1217_v19  ;;  %v306_v61 = vpack.c.bf16 %v299_v59, %v299_v59  ;;  %v813_v2 = vld [vmem:[%s1628_s3 + $0x60] sm:$0xff]  ;;  %v812_v3 = vld [vmem:[%s1628_s3 + $0x58] sm:$0xff]  ;;  %v811_v4 = vld [vmem:[%s1628_s3 + $0x50] sm:$0xff]  ;;  %s288_s15 = scalar_lea.vmem [#allocation5], %s986_s29 }
  0x2b   : > { %714 = vmatpush.bf16.msra.mxu0 %v1192_v20  ;;  %v810_v5 = vld [vmem:[%s1628_s3 + $0x48] sm:$0xff]  ;;  %v809_v6 = vld [vmem:[%s1628_s3 + $0x40] sm:$0xff]  ;;  %v808_v7 = vld [vmem:[%s1628_s3 + $0x38] sm:$0xff]  ;;  %s906_s16 = sshll.u32 %s288_s15, 4  ;;  %s907_s16 = int_to_ptr.vmem [resolvable:$true] %s906_s16 }
  0x2c   : > { %727 = vmatpush.bf16.msra.mxu1 %v1200_v21  ;;  %v807_v8 = vld [vmem:[%s1628_s3 + $0x30] sm:$0xff]  ;;  %v806_v9 = vld [vmem:[%s1628_s3 + $0x28] sm:$0xff]  ;;  %v805_v10 = vld [vmem:[%s1628_s3 + $0x20] sm:$0xff] }
  0x2d   : > { %740 = vmatpush.bf16.msra.mxu2 %v1208_v22  ;;  %v804_v11 = vld [vmem:[%s1628_s3 + $0x18] sm:$0xff]  ;;  %v803_v14 = vld [vmem:[%s1628_s3 + $0x10] sm:$0xff]  ;;  %v802_v15 = vld [vmem:[%s1628_s3 + $0x8] sm:$0xff] }
  0x2e   : > { %753 = vmatpush.bf16.msra.mxu3 %v1216_v23  ;;  %v801_v16 = vld [vmem:[%s1628_s3] sm:$0xff]  ;;  %v849_v17 = vld [vmem:[%s1630_s5 + $0x38] sm:$0xff]  ;;  %v848_v18 = vld [vmem:[%s1630_s5 + $0x30] sm:$0xff] }
  0x2f   : > { %715 = vmatpush.bf16.msra.mxu0 %v1191_v24  ;;  %v847_v21 = vld [vmem:[%s1630_s5 + $0x28] sm:$0xff]  ;;  %v846_v24 = vld [vmem:[%s1630_s5 + $0x20] sm:$0xff] }
  0x30   : > { %728 = vmatpush.bf16.msra.mxu1 %v1199_v25  ;;  %v1292_v25 = vld [vmem:[%s1627_s2] ss:$0 sm:$0xff] }
  0x31   : > { %741 = vmatpush.bf16.msra.mxu2 %v1207_v26  ;;  %v845_v26 = vld [vmem:[%s1630_s5 + $0x18] sm:$0xff] }
  0x32   : > { %754 = vmatpush.bf16.msra.mxu3 %v1215_v28 }
  0x33   : > { %716 = vmatpush.bf16.msra.mxu0 %v1190_v27  ;;  %v844_v27 = vld [vmem:[%s1630_s5 + $0x10] sm:$0xff] }
  0x34   : > { %729 = vmatpush.bf16.msra.mxu1 %v1198_v29 }
  0x35   : > { %742 = vmatpush.bf16.msra.mxu2 %v1206_v34 }
  0x36   : > { %717 = vmatmul.bf16.vlgmr.msra.gmra.mxu0 %v302_v36  ;;  %755 = vmatpush.bf16.msra.mxu3 %v1214_v38 }
  0x37   : > { %761 = vmatpush.bf16.msrb.mxu0 %v1229_v32  ;;  %730 = vmatmul.bf16.vlgmr.msra.gmra.mxu1 %v303_v37 }
  0x38   : > { %774 = vmatpush.bf16.msrb.mxu1 %v1237_v33  ;;  %743 = vmatmul.bf16.vlgmr.msra.gmra.mxu2 %v304_v43 }
  0x39   : > { %794 = vmatpush.bf16.msrb.mxu2 %v1238_v39  ;;  %756 = vmatmul.bf16.vlgmr.msra.gmra.mxu3 %v305_v44  ;;  %v843_v44 = vld [vmem:[%s1630_s5 + $0x8] sm:$0xff] }
  0x3a   : > { %821 = vmatpush.msrb.mxu3 %v816_v63 }
  0x3b   : > { %762 = vmatpush.bf16.msrb.mxu0 %v1228_v41 }
  0x3c   : > { %775 = vmatpush.bf16.msrb.mxu1 %v1236_v42  ;;  %822 = vmatpush.msrb.mxu3 %v815_v0 }
  0x3d   : > { %866 = vmatpush.msra.mxu2 %v849_v17 }
  0x3e   : > { %823 = vmatpush.msrb.mxu3 %v814_v1 }
  0x3f   : > { %763 = vmatpush.bf16.msrb.mxu0 %v1227_v45  ;;  %867 = vmatpush.msra.mxu2 %v848_v18  ;;  %v842_v45 = vld [vmem:[%s1630_s5] sm:$0xff] }
  0x40   : > { %776 = vmatpush.bf16.msrb.mxu1 %v1235_v46  ;;  %824 = vmatpush.msrb.mxu3 %v813_v2  ;;  %v1293_v46 = vld [vmem:[%s1629_s4] ss:$0 sm:$0xff] }
  0x41   : > { %868 = vmatpush.msra.mxu2 %v847_v21 }
  0x42   : > { %825 = vmatpush.msrb.mxu3 %v812_v3 }
  0x43   : > { %764 = vmatpush.bf16.msrb.mxu0 %v1226_v47  ;;  %869 = vmatpush.msra.mxu2 %v846_v24 }
  0x44   : > { %777 = vmatpush.bf16.msrb.mxu1 %v1234_v48  ;;  %826 = vmatpush.msrb.mxu3 %v811_v4 }
  0x45   : > { %870 = vmatpush.msra.mxu2 %v845_v26 }
  0x46   : > { %827 = vmatpush.msrb.mxu3 %v810_v5 }
  0x47   : > { %765 = vmatpush.bf16.msrb.mxu0 %v1225_v49  ;;  %871 = vmatpush.msra.mxu2 %v844_v27 }
  0x48   : > { %778 = vmatpush.bf16.msrb.mxu1 %v1233_v50  ;;  %1184 = vmatmul.msk.bf16.vlgmr.msrb.gmra.mxu2 %vm705_vm0, %v308_v54  ;;  %v878_v50 = vlaneseq }
  0x49   : > { %828 = vmatpush.msrb.mxu3 %v809_v6  ;;  %872 = vmatpush.msra.mxu2 %v843_v44 }
  0x4a   : > { %v879_v51 = vand.u32 127, %v878_v50 }
  0x4b   : > { %766 = vmatpush.bf16.msrb.mxu0 %v1224_v52  ;;  %829 = vmatpush.msrb.mxu3 %v808_v7  ;;  %v1294_v52 = vld [vmem:[%s1631_s6] ss:$0 sm:$0xff] }
  0x4c   : > { %779 = vmatpush.bf16.msrb.mxu1 %v1232_v53  ;;  %873 = vmatpush.msra.mxu2 %v842_v45  ;;  %vm880_vm2 = vcmp.lt.s32.totalorder %v879_v51, 10 }
  0x4d   : > { %830 = vmatpush.msrb.mxu3 %v807_v8 }
  0x4f   : > { %767 = vmatpush.bf16.msrb.mxu0 %v1223_v55  ;;  %831 = vmatpush.msrb.mxu3 %v806_v9 }
  0x50   : > { %780 = vmatpush.bf16.msrb.mxu1 %v1231_v56 }
  0x51   : > { %832 = vmatpush.msrb.mxu3 %v805_v10 }
  0x53   : > { %768 = vmatpush.bf16.msrb.mxu0 %v1222_v57  ;;  %833 = vmatpush.msrb.mxu3 %v804_v11 }
  0x54   : > { %781 = vmatpush.bf16.msrb.mxu1 %v1230_v58 }
  0x55   : > { %834 = vmatpush.msrb.mxu3 %v803_v14 }
  0x56   : > { %769 = vmatmul.bf16.vlgmr.msrb.gmra.mxu0 %v306_v61 }
  0x57   : > { %782 = vmatmul.bf16.vlgmr.msrb.gmra.mxu1 %v307_v62  ;;  %835 = vmatpush.msrb.mxu3 %v802_v15 }
  0x59   : > { %836 = vmatpush.msrb.mxu3 %v801_v16 }
  0xb3   : > { %v718_v12 = vpop.f32.mrf.mxu0 }
  0xb4   : > { %v731_v13 = vpop.f32.mrf.mxu1  ;;  %v719_v28 = vadd.f32 %v1292_v25, %v718_v12 }
  0xb6   : > { %v732_v31 = vadd.f32 %v731_v13, %v719_v28 }
  0xbb   : > { %v720_v19 = vpop.f32.mrf.mxu0  ;;  %v744_v22 = vpop.f32.mrf.mxu2 }
  0xbc   : > { %v733_v20 = vpop.f32.mrf.mxu1  ;;  %v757_v23 = vpop.f32.mrf.mxu3  ;;  %v745_v32 = vadd.f32 %v744_v22, %v732_v31 }
  0xbe   : > { %v758_v34 = vadd.f32 %v757_v23, %v745_v32 }
  0xc3   : > { %v746_v29 = vpop.f32.mrf.mxu2 }
  0xc4   : > { %v759_v30 = vpop.f32.mrf.mxu3 }
  0xcb   : > { %v796_v33 = vpop.f32.mrf.mxu2 }
  0xd3   : > { %v770_v35 = vpop.f32.mrf.mxu0  ;;  %v798_v39 = vpop.f32.mrf.mxu2 }
  0xd4   : > { %v783_v36 = vpop.f32.mrf.mxu1  ;;  %v771_v37 = vadd.f32 %v770_v35, %v758_v34 }
  0xd6   : > { %v784_v38 = vadd.f32 %v783_v36, %v771_v37 }
  0xd8   : > { %v797_v40 = vadd.f32 %v796_v33, %v784_v38 }
  0xda   : > { %v800_v41 = vmax.f32 %v797_v40, 0.0 }
  0xdb   : > { %v772_v42 = vpop.f32.mrf.mxu0 }
  0xdc   : > { %v785_v43 = vpop.f32.mrf.mxu1  ;;  %837 = vmatmul.f32.vlgmr.msrb.gmra.mxu3 %v800_v41 }
 0x15f   : > { %v838_v47 = vpop.f32.mrf.mxu3 }
 0x160   : > { %v839_v48 = vadd.f32 %v1293_v46, %v838_v47 }
 0x162   : > { %v841_v49 = vmax.f32 %v839_v48, 0.0 }
 0x164   : > { %1185 = vmatmul.msk.f32.vlgmr.msra.gmra.mxu2 %vm854_vm1, %v841_v49 }
 0x1e7   : > { %v875_v53 = vpop.f32.mrf.mxu2 }
 0x1e8   : > { %v876_v54 = vadd.f32 %v1294_v52, %v875_v53 }
 0x1ea   : > { %v881_v55 = vsel %vm880_vm2, %v876_v54, -1e+30 }
 0x1eb   : > { %882 = vmax.xlane.f32.xlu0 %v881_v55 }
 0x25e   : > { %v883_v56 = vpop.xlane.xlu0 %882 }
 0x25f   : > { %v884_v57 = vsub.f32 %v881_v55, %v883_v56 }
 0x261   : > { %v885_v58 = vmul.f32 1.442695, %v884_v57 }
 0x263   : > { %1295 = vpow2.f32 %v885_v58 }
 0x269   : > { %v1296_v59 = vpop.eup %1295 }
 0x26a   : > { %887 = vadd.xlane.f32.xlu0 %v1296_v59 }
 0x2dd   : > { %v888_v60 = vpop.xlane.xlu0 %887 }
 0x2de   : > { %1297 = vlog2.f32 %v888_v60 }
 0x2e4   : > { %v1298_v61 = vpop.eup %1297 }
 0x2e5   : > { %v890_v62 = vmul.f32 0.6931472, %v1298_v61 }
 0x2e7   : > { %v891_v63 = vsub.f32 %v884_v57, %v890_v62 }
 0x2e9   : > { %892 = vst [vmem:[%s288_s15] sm:$0xff] %v891_v63 }
 0x2ea   : > { %1356 = shalt.err (!%p1353_p8)
}
 0x2eb   : > { %1244 = dma.vmem_to_hbm [thread:$0]  (%p1478_p5), %s907_s16, 128, %s909_s17, %s894_s18  }
 0x2ec PF: > { %p1256_p9 = scmp.ge.s32.totalorder %s1395_s27, 2  ;;  %s920_s23 = sand.u32 1, %s1383_s24  }
 0x2ed   : > { %s921_s9 = scalar_lea.sflag [#allocation4], %s920_s23 }
 0x2ee   : > { %p1251_p10 = pnand %p1256_p9, %p1482_p6 }
 0x2f0   : > { %p1252_p11 = pneg %p1251_p10 }
 0x2f2   : > { %1378 = dma.done.wait (%p1252_p11), %s921_s9, 128  }
 0x2f3   : > { %1380 = vsyncadd (%p1252_p11), %s921_s9, 4294967168  ;;  %p18_p12 = scmp.ge.s32.totalorder %s1465_s30, 4   ;;  %s1635_s24 = smov %s1387_s25 }
 0x2f4   : > { %s1636_s25 = smov %s1391_s26  ;;  %s1637_s26 = smov %s1476_s10 }
 0x2f5   : > { %s1638_s27 = smov %s1465_s30  ;;  %20 = sbr.rel (!%p18_p12) target bundleno = 4 (0x4), region = 88 }
 0x2fa   :  { %927 = vsyncpa [#allocation3], 1 }
 0x2fb   :  { %929 = vsyncpa [#allocation3 + $0x1], 1 }
 0x2fc   :  { %930 = vsyncpa [#allocation4], 1 }
 0x2fd   :  { %932 = vsyncpa [#allocation4 + $0x1], 1 }

</bundles_post_ra>
